<compile_context>
chip_gen: v7x
topology: tpu7x:2x2x1
jax: 0.10.0
libtpu: 0.0.40
codegen_flags: <defaults>
</compile_context>

<pallas_src>
import jax
import jax.numpy as jnp
from jax.experimental import pallas as pl
from jax.experimental.pallas import tpu as pltpu

IN_FEATURES = 1488
HIDDEN = 128
NUM_CLASSES = 101
N_PAD = 128   # lane-dense output width; sliced back to 101 in the wrapper


def _round_up(n, m):
    return ((n + m - 1) // m) * m


def _fused_linear_kernel(x_ref, w_ref, b_ref, o_ref):
    # Cast x to bf16 in-register (hidden under the x DMA), single MXU matmul
    # with f32 accumulation, f32 bias add, f32 store.
    x_bf = x_ref[...].astype(jnp.bfloat16)
    y = jnp.dot(x_bf, w_ref[...], preferred_element_type=jnp.float32)
    o_ref[...] = y + b_ref[...]


def _fuse_params(w1, b1, w2, b2):
    """Fold the two affine layers into one: W = W1@W2 (1488,101), b = b1@W2 + b2.

    Valid only because there is no nonlinearity between fc1 and fc2.
    """
    w_fused = jnp.dot(w1, w2, preferred_element_type=jnp.float32)       # (1488, 101)
    b_fused = jnp.dot(b1, w2, preferred_element_type=jnp.float32) + b2  # (101,)
    return w_fused, b_fused


def prepare_params(w1, b1, w2, b2):
    """One-time parameter preparation (hoisted out of the per-call path).

    Returns:
      w_pad: (1488, 128) bf16 fused weight, class dim zero-padded 101 -> 128.
      b_pad: (1, 128)    f32  fused bias, zero-padded.
    """
    w_fused, b_fused = _fuse_params(w1, b1, w2, b2)
    w_pad = jnp.pad(w_fused, ((0, 0), (0, N_PAD - NUM_CLASSES))).astype(jnp.bfloat16)
    b_pad = jnp.pad(b_fused, (0, N_PAD - NUM_CLASSES)).reshape(1, N_PAD)
    return w_pad, b_pad


def ingr2class_forward(x, w_pad, b_pad, *, batch_tile=1024):
    """x: (B, 1488) f32; w_pad: (1488, 128) bf16; b_pad: (1, 128) f32.

    Returns (B, 101) f32 logits, numerically matching
    fc2(fc1(x)) up to the bf16 cast of x and the fused weight.
    """
    assert batch_tile % 8 == 0
    B = x.shape[0]

    # Batch tile: whole batch (rounded up to a sublane multiple) when it fits
    # in one block; otherwise `batch_tile` rows per grid step, adjusted so the
    # tile count is even (2-TensorCore balance on v7x).  The final block may be
    # partial; Pallas masks the out-of-bounds rows.
    tb = min(batch_tile, _round_up(B, 8))
    n_tiles = pl.cdiv(B, tb)
    if n_tiles > 1 and n_tiles % 2 == 1:
        tb = _round_up(pl.cdiv(B, n_tiles + 1), 8)
        n_tiles = pl.cdiv(B, tb)

    out = pl.pallas_call(
        _fused_linear_kernel,
        out_shape=jax.ShapeDtypeStruct((B, N_PAD), jnp.float32),
        grid_spec=pltpu.PrefetchScalarGridSpec(
            num_scalar_prefetch=0,
            grid=(n_tiles,),
            in_specs=[
                # x: f32, unpadded K (1488 == full array dim, so legal).
                pl.BlockSpec((tb, IN_FEATURES), lambda i: (i, 0)),
                # Fused bf16 weight: VMEM-resident across all grid steps.
                pl.BlockSpec((IN_FEATURES, N_PAD), lambda i: (0, 0)),
                # Fused f32 bias.
                pl.BlockSpec((1, N_PAD), lambda i: (0, 0)),
            ],
            out_specs=pl.BlockSpec((tb, N_PAD), lambda i: (i, 0)),
        ),
        compiler_params=pltpu.CompilerParams(
            # Independent batch tiles -> megacore sharding on v7x.
            dimension_semantics=("parallel",),
        ),
    )(x, w_pad, b_pad)

    # Exact module output shape: trim the 27 lane-pad columns.
    return out[:, :NUM_CLASSES]


def init_params(key):
    """Deterministic init matching the nn.Linear shapes (Kaiming-uniform-ish)."""
    k1, k2, k3, k4 = jax.random.split(key, 4)
    lim1 = 1.0 / (IN_FEATURES ** 0.5)
    lim2 = 1.0 / (HIDDEN ** 0.5)
    # Stored as (in, out) == transpose of PyTorch's (out, in) weight layout.
    w1 = jax.random.uniform(k1, (IN_FEATURES, HIDDEN), jnp.float32, -lim1, lim1)
    b1 = jax.random.uniform(k2, (HIDDEN,), jnp.float32, -lim1, lim1)
    w2 = jax.random.uniform(k3, (HIDDEN, NUM_CLASSES), jnp.float32, -lim2, lim2)
    b2 = jax.random.uniform(k4, (NUM_CLASSES,), jnp.float32, -lim2, lim2)
    return w1, b1, w2, b2


def _check(out, x, w1, b1, w2, b2):
    # (a) loose check against the exact f32 two-layer reference (bf16 cast of
    #     x / fused weight loosens the tolerance; fine for inference logits).
    ref_f32 = (x @ w1 + b1) @ w2 + b2
    assert out.shape == ref_f32.shape
    assert jnp.allclose(out, ref_f32, atol=2e-2, rtol=2e-2)
    # (b) tight check against a bf16-matched fused reference (same rounding as
    #     the kernel, differing only in accumulation order).
    w_fused, b_fused = _fuse_params(w1, b1, w2, b2)
    x_bf = x.astype(jnp.bfloat16).astype(jnp.float32)
    w_bf = w_fused.astype(jnp.bfloat16).astype(jnp.float32)
    ref_bf = x_bf @ w_bf + b_fused
    assert jnp.allclose(out, ref_bf, atol=1e-3, rtol=1e-3)


if __name__ == "__main__":
    key = jax.random.PRNGKey(0)
    kx, kp, kx2 = jax.random.split(key, 3)
    w1, b1, w2, b2 = init_params(kp)

    # One-time param fusion / padding (hoisted out of the per-call path).
    w_pad, b_pad = prepare_params(w1, b1, w2, b2)
    fwd = jax.jit(ingr2class_forward, static_argnames=("batch_tile",))

    # Small-batch serving case: single (possibly partial) block, grid=(1,).
    B = 8
    x = jax.random.normal(kx, (B, IN_FEATURES), jnp.float32)
    out = jax.block_until_ready(fwd(x, w_pad, b_pad))
    assert out.shape == (B, NUM_CLASSES)
    _check(out, x, w1, b1, w2, b2)

    # Larger, non-tile-multiple batch exercising the gridded / partial-final-
    # block path (600 rows, tile adjusted to 152 -> 4 even tiles).
    B2 = 600
    x2 = jax.random.normal(kx2, (B2, IN_FEATURES), jnp.float32)
    out2 = jax.block_until_ready(fwd(x2, w_pad, b_pad, batch_tile=256))
    assert out2.shape == (B2, NUM_CLASSES)
    _check(out2, x2, w1, b1, w2, b2)

    print("KERNEL_OK")
</pallas_src>

<mosaic_0001>
module attributes {stable_mosaic.version = 11 : i64} {
  func.func @_fused_linear_kernel(%arg0: i32, %arg1: memref<8x1488xf32, #tpu.memory_space<vmem>>, %arg2: memref<1488x128xbf16, #tpu.memory_space<vmem>>, %arg3: memref<1x128xf32, #tpu.memory_space<vmem>>, %arg4: memref<8x128xf32, #tpu.memory_space<vmem>>) attributes {dimension_semantics = [#tpu.dimension_semantics<parallel>], iteration_bounds = array<i64: 1>, scalar_prefetch = 0 : i64, scratch_operands = 0 : i64, tpu.core_type = #tpu.core_type<tc>, window_params = [{transform_indices = @transform_0, window_bounds = array<i64: 8, 1488>}, {pipeline_mode = #tpu.pipeline_mode<synchronous>, transform_indices = @transform_1, window_bounds = array<i64: 1488, 128>}, {pipeline_mode = #tpu.pipeline_mode<synchronous>, transform_indices = @transform_2, window_bounds = array<i64: 1, 128>}, {transform_indices = @transform_3, window_bounds = array<i64: 8, 128>}]} {
    %c0 = arith.constant 0 : index
    %c0_0 = arith.constant 0 : index
    %0 = vector.load %arg1[%c0, %c0_0] : memref<8x1488xf32, #tpu.memory_space<vmem>>, vector<8x1488xf32>
    %1 = arith.truncf %0 : vector<8x1488xf32> to vector<8x1488xbf16>
    %c0_1 = arith.constant 0 : index
    %c0_2 = arith.constant 0 : index
    %2 = vector.load %arg2[%c0_1, %c0_2] : memref<1488x128xbf16, #tpu.memory_space<vmem>>, vector<1488x128xbf16>
    %cst = arith.constant dense<0.000000e+00> : vector<8x128xf32>
    %3 = tpu.matmul %1, %2, %cst {dimension_numbers = #tpu.dot_dimension_numbers<[1], [0], [0], [1], [0, 0, 1, 1], [], []>} : vector<8x1488xbf16>, vector<1488x128xbf16>, vector<8x128xf32> -> vector<8x128xf32>
    %c0_3 = arith.constant 0 : index
    %c0_4 = arith.constant 0 : index
    %4 = vector.load %arg3[%c0_3, %c0_4] : memref<1x128xf32, #tpu.memory_space<vmem>>, vector<1x128xf32>
    %5 = vector.broadcast %4 : vector<1x128xf32> to vector<8x128xf32>
    %6 = arith.addf %3, %5 : vector<8x128xf32>
    %c0_5 = arith.constant 0 : index
    %c0_6 = arith.constant 0 : index
    %7 = vector.load %arg4[%c0_5, %c0_6] : memref<8x128xf32, #tpu.memory_space<vmem>>, vector<8x128xf32>
    tpu.vector_store %arg4[%c0_5, %c0_6], %6 {strides = array<i32>} : memref<8x128xf32, #tpu.memory_space<vmem>>, vector<8x128xf32>,
    return
  }
  func.func @transform_0(%arg0: i32) -> (i32, i32) {
    %c0_i32 = arith.constant 0 : i32
    %c0_i32_0 = arith.constant 0 : i32
    return %arg0, %c0_i32 : i32, i32
  }
  func.func @transform_1(%arg0: i32) -> (i32, i32) {
    %c0_i32 = arith.constant 0 : i32
    %c0_i32_0 = arith.constant 0 : i32
    %c0_i32_1 = arith.constant 0 : i32
    return %c0_i32, %c0_i32_0 : i32, i32
  }
  func.func @transform_2(%arg0: i32) -> (i32, i32) {
    %c0_i32 = arith.constant 0 : i32
    %c0_i32_0 = arith.constant 0 : i32
    %c0_i32_1 = arith.constant 0 : i32
    return %c0_i32, %c0_i32_0 : i32, i32
  }
  func.func @transform_3(%arg0: i32) -> (i32, i32) {
    %c0_i32 = arith.constant 0 : i32
    %c0_i32_0 = arith.constant 0 : i32
    return %arg0, %c0_i32 : i32, i32
  }
}

</mosaic_0001>

<bundles_post_ra>
// kernel: ingr2class_forward.1
= control target key start
LH: loop header
LB: loop body
LE: loop exit
PB: predicated region body
PF: predicated region fallthrough
CT: control target
= control target key end

     0   :  { %8 = vsyncpa [#allocation3], 0  ;;  %s1539_s0 = inlined_call_operand.hbm [shape: f32[8,1488], index: 0, kind: input, shape index: {}]   ;;  %s1540_s1 = inlined_call_operand.hbm [shape: bf16[1488,128], index: 1, kind: input, shape index: {}]   ;;  %s1541_s2 = inlined_call_operand.vmem [shape: f32[1,128], index: 2, kind: input, shape index: {}]   ;;  %s1542_s3 = inlined_call_operand.hbm [shape: f32[8,128], index: 3, kind: output, shape index: {}]  }
   0x1   :  { %9 = vsyncpa [#allocation6], 0 }
   0x2   :  { %10 = vsyncpa [#allocation4], 0  ;;  %s1454_s12 = smov [#allocation2]   ;;  %s1455_s14 = smov [#allocation5]  }
   0x3   :  { %s17_s13 = sshll.u32 %s1454_s12, 4  ;;  %s26_s15 = sshll.u32 %s1455_s14, 4  ;;  %s18_s13 = int_to_ptr.vmem [resolvable:$true] %s17_s13  ;;  %s1480_s15 = int_to_ptr.vmem [resolvable:$true] %s26_s15 }
   0x4   :  { %s1382_s18 = scalar_lea.hbm %s1539_s0, 1536 }
   0x5   :  { %p1383_p0 = scmp.ne.s32.totalorder %s1539_s0, %s1382_s18  ;;  %p1386_p1 = scmp.lt.u32.totalorder %s1382_s18, %s1539_s0 }
   0x7   :  { %p1388_p2 = pnand %p1386_p1, %p1383_p0 }
   0x9   :  { %1391 = shalt.err (!%p1388_p2)
}
   0xa   :  { %s1392_s23 = scalar_lea.vmem %s18_s13, 1536  ;;  %p1397_p4 = scmp.lt.s32.totalorder %s18_s13, %s18_s13 }
   0xb   :  { %p1393_p3 = scmp.ne.s32.totalorder %s18_s13, %s1392_s23  ;;  %p1398_p5 = scmp.lt.s32.totalorder %s1392_s23, %s1392_s23 }
   0xd   :  { %p1399_p6 = por %p1398_p5, %p1397_p4 }
   0xf   :  { %p1400_p7 = pnand %p1399_p6, %p1393_p3 }
  0x11   :  { %1403 = shalt.err (!%p1400_p7)
}
  0x12   :  { %20 = dma.hbm_to_vmem [thread:$0]  %s1539_s0, 1536, %s18_s13, [#allocation3]  }
  0x13   :  { %s1404_s28 = scalar_lea.hbm %s1540_s1, 11904 }
  0x14   :  { %p1405_p8 = scmp.ne.s32.totalorder %s1540_s1, %s1404_s28  ;;  %p1408_p9 = scmp.lt.u32.totalorder %s1404_s28, %s1540_s1 }
  0x16   :  { %p1410_p10 = pnand %p1408_p9, %p1405_p8 }
  0x18   :  { %1413 = shalt.err (!%p1410_p10)
}
  0x19   :  { %s1414_s6 = scalar_lea.vmem %s1480_s15, 11904  ;;  %p1419_p12 = scmp.lt.s32.totalorder %s1480_s15, %s1480_s15 }
  0x1a   :  { %p1415_p11 = scmp.ne.s32.totalorder %s1480_s15, %s1414_s6  ;;  %p1420_p13 = scmp.lt.s32.totalorder %s1414_s6, %s1414_s6 }
  0x1c   :  { %p1421_p0 = por %p1420_p13, %p1419_p12 }
  0x1e   :  { %p1422_p1 = pnand %p1421_p0, %p1415_p11 }
  0x20   :  { %1425 = shalt.err (!%p1422_p1)
}
  0x21   :  { %s1456_s0 = smov 64   ;;  %s1457_s7 = smov 4  }
  0x22   :  { %32 = dma.hbm_to_vmem [thread:$0]  %s1540_s1, 11904, %s1480_s15, [#allocation6], %s1456_s0, %s1456_s0, %s1457_s7  }
  0x23   :  { %1448 = dma.done.wait [#allocation3], 1536  }
  0x24   :  { %1449 = vsyncadd [#allocation3], 4294965760 }
  0x25   :  { %1450 = dma.done.wait [#allocation6], 11904  }
  0x26   :  { %1451 = vsyncadd [#allocation6], 4294955392  ;;  %v1289_v0 = vld [vmem:[#allocation5 + $0x40] sm:$0xff]   ;;  %v1293_v4 = vld [vmem:[#allocation5 + $0x48] sm:$0xff]   ;;  %vm817_vm0 = vcmask 654336  }
  0x27   :  { %v1290_v1 = vld [vmem:[#allocation5 + $0xc0] sm:$0xff]   ;;  %1173 = vmatprep.subr.bf16.mxu0 %v1289_v0  ;;  %v1294_v5 = vld [vmem:[#allocation5 + $0xc8] sm:$0xff]   ;;  %v1297_v8 = vld [vmem:[#allocation5 + $0x50] sm:$0xff]  }
  0x28   :  { %v1291_v2 = vld [vmem:[#allocation5] sm:$0xff]   ;;  %1195 = vmatprep.subr.bf16.mxu1 %v1290_v1  ;;  %v1295_v6 = vld [vmem:[#allocation5 + $0x8] sm:$0xff]   ;;  %v1298_v9 = vld [vmem:[#allocation5 + $0xd0] sm:$0xff]  }
  0x29   :  { %v1292_v3 = vld [vmem:[#allocation5 + $0x80] sm:$0xff]   ;;  %1174 = vmatpush3.bf16.msra.mxu0 %v1291_v2  ;;  %v1296_v7 = vld [vmem:[#allocation5 + $0x88] sm:$0xff]   ;;  %v1299_v10 = vld [vmem:[#allocation5 + $0x10] sm:$0xff]  }
  0x2a   :  { %1196 = vmatpush3.bf16.msra.mxu1 %v1292_v3  ;;  %1175 = vmatprep.subr.bf16.mxu0 %v1293_v4  ;;  %v1300_v11 = vld [vmem:[#allocation5 + $0x90] sm:$0xff]   ;;  %v1301_v12 = vld [vmem:[#allocation5 + $0x58] sm:$0xff]   ;;  %v1305_v16 = vld [vmem:[#allocation5 + $0x60] sm:$0xff]  }
  0x2b   :  { %1197 = vmatprep.subr.bf16.mxu1 %v1294_v5  ;;  %v1302_v13 = vld [vmem:[#allocation5 + $0xd8] sm:$0xff]   ;;  %v1306_v17 = vld [vmem:[#allocation5 + $0xe0] sm:$0xff]   ;;  %v1309_v20 = vld [vmem:[#allocation5 + $0x68] sm:$0xff]  }
  0x2c   :  { %v1303_v14 = vld [vmem:[#allocation5 + $0x18] sm:$0xff]   ;;  %v1307_v18 = vld [vmem:[#allocation5 + $0x20] sm:$0xff]   ;;  %v1310_v21 = vld [vmem:[#allocation5 + $0xe8] sm:$0xff]  }
  0x2d   :  { %1176 = vmatpush3.bf16.msra.mxu0 %v1295_v6  ;;  %v1304_v15 = vld [vmem:[#allocation5 + $0x98] sm:$0xff]   ;;  %v1308_v19 = vld [vmem:[#allocation5 + $0xa0] sm:$0xff]   ;;  %v1311_v22 = vld [vmem:[#allocation5 + $0x28] sm:$0xff]  }
  0x2e   :  { %1198 = vmatpush3.bf16.msra.mxu1 %v1296_v7  ;;  %1177 = vmatprep.subr.bf16.mxu0 %v1297_v8  ;;  %v1312_v23 = vld [vmem:[#allocation5 + $0xa8] sm:$0xff]   ;;  %v1313_v24 = vld [vmem:[#allocation5 + $0x70] sm:$0xff]   ;;  %v1317_v28 = vld [vmem:[#allocation5 + $0x78] sm:$0xff]  }
  0x2f   :  { %1199 = vmatprep.subr.bf16.mxu1 %v1298_v9  ;;  %v1314_v25 = vld [vmem:[#allocation5 + $0xf0] sm:$0xff]   ;;  %v1318_v29 = vld [vmem:[#allocation5 + $0xf8] sm:$0xff]   ;;  %v43_v32 = vld [vmem:[#allocation2 + $0x8] sm:$0xff] }
  0x30   :  { %v1315_v26 = vld [vmem:[#allocation5 + $0x30] sm:$0xff]   ;;  %v1319_v30 = vld [vmem:[#allocation5 + $0x38] sm:$0xff]   ;;  %v42_v34 = vld [vmem:[#allocation2] sm:$0xff]  ;;  %v55_v35 = vpack.c.bf16 %v43_v32, %v43_v32 }
  0x31   :  { %1178 = vmatpush3.bf16.msra.mxu0 %v1299_v10  ;;  %v1316_v27 = vld [vmem:[#allocation5 + $0xb0] sm:$0xff]   ;;  %v1320_v31 = vld [vmem:[#allocation5 + $0xb8] sm:$0xff]   ;;  %v54_v37 = vpack.c.bf16 %v42_v34, %v42_v34  ;;  %v1321_v40 = vld [vmem:[#allocation5 + $0x140] sm:$0xff]  }
  0x32   :  { %1200 = vmatpush3.bf16.msra.mxu1 %v1300_v11  ;;  %1179 = vmatprep.subr.bf16.mxu0 %v1301_v12  ;;  %v45_v33 = vld [vmem:[#allocation2 + $0x18] sm:$0xff]  ;;  %v44_v38 = vld [vmem:[#allocation2 + $0x10] sm:$0xff]  ;;  %v1322_v41 = vld [vmem:[#allocation5 + $0x1c0] sm:$0xff]  }
  0x33   :  { %1201 = vmatprep.subr.bf16.mxu1 %v1302_v13  ;;  %v57_v36 = vpack.c.bf16 %v45_v33, %v45_v33  ;;  %v56_v39 = vpack.c.bf16 %v44_v38, %v44_v38  ;;  %853 = vmatprep.mubr.bf16.mxu0 %v55_v35  ;;  %v1323_v42 = vld [vmem:[#allocation5 + $0x100] sm:$0xff]   ;;  %v1325_v44 = vld [vmem:[#allocation5 + $0x148] sm:$0xff]   ;;  %v1329_v48 = vld [vmem:[#allocation5 + $0x150] sm:$0xff]  }
  0x34   :  { %v1324_v43 = vld [vmem:[#allocation5 + $0x180] sm:$0xff]   ;;  %v1326_v45 = vld [vmem:[#allocation5 + $0x1c8] sm:$0xff]   ;;  %v1330_v49 = vld [vmem:[#allocation5 + $0x1d0] sm:$0xff]  }
  0x35   :  { %1180 = vmatpush3.bf16.msra.mxu0 %v1303_v14  ;;  %893 = vmatprep.mubr.bf16.mxu1 %v57_v36  ;;  %v1327_v46 = vld [vmem:[#allocation5 + $0x108] sm:$0xff]   ;;  %v1331_v50 = vld [vmem:[#allocation5 + $0x110] sm:$0xff]   ;;  %v1333_v52 = vld [vmem:[#allocation5 + $0x158] sm:$0xff]  }
  0x36   :  { %1202 = vmatpush3.bf16.msra.mxu1 %v1304_v15  ;;  %1181 = vmatprep.subr.bf16.mxu0 %v1305_v16  ;;  %v1328_v47 = vld [vmem:[#allocation5 + $0x188] sm:$0xff]   ;;  %v1332_v51 = vld [vmem:[#allocation5 + $0x190] sm:$0xff]   ;;  %v1334_v53 = vld [vmem:[#allocation5 + $0x1d8] sm:$0xff]  }
  0x37   :  { %1203 = vmatprep.subr.bf16.mxu1 %v1306_v17  ;;  %v1335_v54 = vld [vmem:[#allocation5 + $0x118] sm:$0xff]   ;;  %v1337_v56 = vld [vmem:[#allocation5 + $0x160] sm:$0xff]   ;;  %v1341_v60 = vld [vmem:[#allocation5 + $0x168] sm:$0xff]  }
  0x38   :  { %v1336_v55 = vld [vmem:[#allocation5 + $0x198] sm:$0xff]   ;;  %v1338_v57 = vld [vmem:[#allocation5 + $0x1e0] sm:$0xff]   ;;  %v1342_v61 = vld [vmem:[#allocation5 + $0x1e8] sm:$0xff]  }
  0x39   :  { %1182 = vmatpush3.bf16.msra.mxu0 %v1307_v18  ;;  %v1339_v58 = vld [vmem:[#allocation5 + $0x120] sm:$0xff]   ;;  %v1343_v62 = vld [vmem:[#allocation5 + $0x128] sm:$0xff]   ;;  %v1345_v0 = vld [vmem:[#allocation5 + $0x170] sm:$0xff]  }
  0x3a   :  { %1204 = vmatpush3.bf16.msra.mxu1 %v1308_v19  ;;  %1183 = vmatprep.subr.bf16.mxu0 %v1309_v20  ;;  %v1340_v59 = vld [vmem:[#allocation5 + $0x1a0] sm:$0xff]   ;;  %v1344_v63 = vld [vmem:[#allocation5 + $0x1a8] sm:$0xff]   ;;  %v1346_v1 = vld [vmem:[#allocation5 + $0x1f0] sm:$0xff]   ;;  %v1458_v19 = vmov 0  }
  0x3b   :  { %1205 = vmatprep.subr.bf16.mxu1 %v1310_v21  ;;  %v1347_v2 = vld [vmem:[#allocation5 + $0x130] sm:$0xff]   ;;  %v1349_v4 = vld [vmem:[#allocation5 + $0x178] sm:$0xff]   ;;  %v47_v8 = vld [vmem:[#allocation2 + $0x28] sm:$0xff] }
  0x3c   :  { %v1348_v3 = vld [vmem:[#allocation5 + $0x1b0] sm:$0xff]   ;;  %v1350_v5 = vld [vmem:[#allocation5 + $0x1f8] sm:$0xff]   ;;  %v59_v10 = vpack.c.bf16 %v47_v8, %v47_v8  ;;  %v46_v12 = vld [vmem:[#allocation2 + $0x20] sm:$0xff] }
  0x3d   :  { %1184 = vmatpush3.bf16.msra.mxu0 %v1311_v22  ;;  %v1351_v6 = vld [vmem:[#allocation5 + $0x138] sm:$0xff]   ;;  %v48_v13 = vld [vmem:[#allocation2 + $0x30] sm:$0xff]  ;;  %v58_v14 = vpack.c.bf16 %v46_v12, %v46_v12  ;;  %v1353_v16 = vld [vmem:[#allocation5 + $0x240] sm:$0xff]  }
  0x3e   :  { %1206 = vmatpush3.bf16.msra.mxu1 %v1312_v23  ;;  %1185 = vmatprep.subr.bf16.mxu0 %v1313_v24  ;;  %v1352_v7 = vld [vmem:[#allocation5 + $0x1b8] sm:$0xff]   ;;  %v60_v15 = vpack.c.bf16 %v48_v13, %v48_v13  ;;  %v1354_v17 = vld [vmem:[#allocation5 + $0x200] sm:$0xff]   ;;  %v1356_v20 = vld [vmem:[#allocation5 + $0x248] sm:$0xff]  }
  0x3f   :  { %1207 = vmatprep.subr.bf16.mxu1 %v1314_v25  ;;  %v49_v9 = vld [vmem:[#allocation2 + $0x38] sm:$0xff]  ;;  %v1355_v18 = vld [vmem:[#allocation5 + $0x280] sm:$0xff]   ;;  %v1357_v21 = vld [vmem:[#allocation5 + $0x208] sm:$0xff]  }
  0x40   :  { %v61_v11 = vpack.c.bf16 %v49_v9, %v49_v9  ;;  %v1358_v22 = vld [vmem:[#allocation5 + $0x288] sm:$0xff]   ;;  %v1359_v23 = vld [vmem:[#allocation5 + $0x250] sm:$0xff]  }
  0x41   :  { %1186 = vmatpush3.bf16.msra.mxu0 %v1315_v26  ;;  %v1360_v24 = vld [vmem:[#allocation5 + $0x210] sm:$0xff]   ;;  %v1362_v26 = vld [vmem:[#allocation5 + $0x258] sm:$0xff]   ;;  %v1368_v32 = vld [vmem:[#allocation5 + $0x268] sm:$0xff]  }
  0x42   :  { %1208 = vmatpush3.bf16.msra.mxu1 %v1316_v27  ;;  %1187 = vmatprep.subr.bf16.mxu0 %v1317_v28  ;;  %v1361_v25 = vld [vmem:[#allocation5 + $0x290] sm:$0xff]   ;;  %v1363_v27 = vld [vmem:[#allocation5 + $0x218] sm:$0xff]   ;;  %v1369_v33 = vld [vmem:[#allocation5 + $0x228] sm:$0xff]  }
  0x43   :  { %1209 = vmatprep.subr.bf16.mxu1 %v1318_v29  ;;  %v1364_v28 = vld [vmem:[#allocation5 + $0x298] sm:$0xff]   ;;  %v1365_v29 = vld [vmem:[#allocation5 + $0x260] sm:$0xff]   ;;  %v1370_v34 = vld [vmem:[#allocation5 + $0x2a8] sm:$0xff]  }
  0x44   :  { %v1371_v35 = vld [vmem:[#allocation5 + $0x270] sm:$0xff]  }
  0x45   :  { %1188 = vmatpush3.bf16.msra.mxu0 %v1319_v30  ;;  %v1366_v30 = vld [vmem:[#allocation5 + $0x220] sm:$0xff]   ;;  %v1372_v36 = vld [vmem:[#allocation5 + $0x230] sm:$0xff]  }
  0x46   :  { %1210 = vmatpush3.bf16.msra.mxu1 %v1320_v31  ;;  %1217 = vmatprep.subr.bf16.mxu0 %v1321_v40  ;;  %v1367_v31 = vld [vmem:[#allocation5 + $0x2a0] sm:$0xff]   ;;  %v1373_v38 = vld [vmem:[#allocation5 + $0x2b0] sm:$0xff]   ;;  %v1374_v40 = vld [vmem:[#allocation5 + $0x278] sm:$0xff]  }
  0x47   :  { %1239 = vmatprep.subr.bf16.mxu1 %v1322_v41  ;;  %v1375_v41 = vld [vmem:[#allocation5 + $0x238] sm:$0xff]  }
  0x48   :  { %854 = vmatmul.mubr.bf16.vlgmr.msra.gmra.mrb[0].mxu0 %v54_v37  ;;  %v51_v37 = vld [vmem:[#allocation2 + $0x48] sm:$0xff] }
  0x49   :  { %894 = vmatmul.mubr.bf16.vlgmr.msra.gmra.mrb[0].mxu1 %v56_v39  ;;  %1218 = vmatpush3.bf16.msra.mxu0 %v1323_v42  ;;  %v63_v39 = vpack.c.bf16 %v51_v37, %v51_v37  ;;  %v1376_v42 = vld [vmem:[#allocation5 + $0x2b8] sm:$0xff]  }
  0x4a   :  { %1240 = vmatpush3.bf16.msra.mxu1 %v1324_v43  ;;  %1219 = vmatprep.subr.bf16.mxu0 %v1325_v44  ;;  %v50_v43 = vld [vmem:[#allocation2 + $0x40] sm:$0xff]  ;;  %v53_v44 = vld [vmem:[#allocation2 + $0x58] sm:$0xff] }
  0x4b   :  { %1241 = vmatprep.subr.bf16.mxu1 %v1326_v45  ;;  %933 = vmatprep.mubr.bf16.mxu0 %v59_v10  ;;  %v65_v45 = vpack.c.bf16 %v53_v44, %v53_v44 }
  0x4c   :  { %973 = vmatprep.mubr.bf16.mxu1 %v61_v11 }
  0x4d   :  { %1220 = vmatpush3.bf16.msra.mxu0 %v1327_v46  ;;  %v62_v46 = vpack.c.bf16 %v50_v43, %v50_v43 }
  0x4e   :  { %1242 = vmatpush3.bf16.msra.mxu1 %v1328_v47  ;;  %1221 = vmatprep.subr.bf16.mxu0 %v1329_v48  ;;  %v1377_v47 = vld [vmem:[#allocation5 + $0x2c0] sm:$0xff]   ;;  %v1378_v48 = vld [vmem:[#allocation5 + $0x2c8] sm:$0xff]  }
  0x4f   :  { %1243 = vmatprep.subr.bf16.mxu1 %v1330_v49  ;;  %v1379_v49 = vld [vmem:[#allocation5 + $0x2d0] sm:$0xff]  }
  0x51   :  { %1222 = vmatpush3.bf16.msra.mxu0 %v1331_v50  ;;  %v1380_v50 = vld [vmem:[#allocation5 + $0x2d8] sm:$0xff]  }
  0x52   :  { %1244 = vmatpush3.bf16.msra.mxu1 %v1332_v51  ;;  %1223 = vmatprep.subr.bf16.mxu0 %v1333_v52  ;;  %v1381_v51 = vld [vmem:[#allocation5 + $0x2e0] sm:$0xff]   ;;  %v52_v52 = vld [vmem:[#allocation2 + $0x50] sm:$0xff] }
  0x53   :  { %1245 = vmatprep.subr.bf16.mxu1 %v1334_v53  ;;  %v64_v53 = vpack.c.bf16 %v52_v52, %v52_v52 }
  0x55   :  { %1224 = vmatpush3.bf16.msra.mxu0 %v1335_v54 }
  0x56   :  { %1246 = vmatpush3.bf16.msra.mxu1 %v1336_v55  ;;  %1225 = vmatprep.subr.bf16.mxu0 %v1337_v56  ;;  %v1078_v56 = vld [vmem:[%s1541_s2] ss:$0 sm:$0xff]  ;;  %s1459_s2 = smov [#allocation7]  }
  0x57   :  { %1247 = vmatprep.subr.bf16.mxu1 %v1338_v57  ;;  %s1068_s11 = sshll.u32 %s1459_s2, 4  ;;  %s1069_s11 = int_to_ptr.vmem [resolvable:$true] %s1068_s11 }
  0x58   :  { %s1426_s12 = scalar_lea.vmem %s1069_s11, 128  ;;  %p1431_p3 = scmp.lt.s32.totalorder %s1069_s11, %s1069_s11 }
  0x59   :  { %1226 = vmatpush3.bf16.msra.mxu0 %v1339_v58  ;;  %p1427_p2 = scmp.ne.s32.totalorder %s1069_s11, %s1426_s12  ;;  %p1432_p4 = scmp.lt.s32.totalorder %s1426_s12, %s1426_s12 }
  0x5a   :  { %1248 = vmatpush3.bf16.msra.mxu1 %v1340_v59  ;;  %1227 = vmatprep.subr.bf16.mxu0 %v1341_v60 }
  0x5b   :  { %1249 = vmatprep.subr.bf16.mxu1 %v1342_v61  ;;  %p1433_p5 = por %p1432_p4, %p1431_p3 }
  0x5d   :  { %1228 = vmatpush3.bf16.msra.mxu0 %v1343_v62  ;;  %p1434_p6 = pnand %p1433_p5, %p1427_p2 }
  0x5e   :  { %1250 = vmatpush3.bf16.msra.mxu1 %v1344_v63  ;;  %1229 = vmatprep.subr.bf16.mxu0 %v1345_v0 }
  0x5f   :  { %1251 = vmatprep.subr.bf16.mxu1 %v1346_v1 }
  0x61   :  { %1230 = vmatpush3.bf16.msra.mxu0 %v1347_v2 }
  0x62   :  { %1252 = vmatpush3.bf16.msra.mxu1 %v1348_v3  ;;  %1231 = vmatprep.subr.bf16.mxu0 %v1349_v4 }
  0x63   :  { %1253 = vmatprep.subr.bf16.mxu1 %v1350_v5 }
  0x65   :  { %1232 = vmatpush3.bf16.msra.mxu0 %v1351_v6 }
  0x66   :  { %1254 = vmatpush3.bf16.msra.mxu1 %v1352_v7  ;;  %1261 = vmatprep.subr.bf16.mxu0 %v1353_v16 }
  0x67   :  { %1021 = vmatprep.subr.bf16.mxu1 %v1458_v19 }
  0x68   :  { %934 = vmatmul.mubr.bf16.vlgmr.msra.gmra.mrb[4].mxu0 %v58_v14 }
  0x69   :  { %974 = vmatmul.mubr.bf16.vlgmr.msra.gmra.mrb[4].mxu1 %v60_v15  ;;  %1262 = vmatpush3.bf16.msra.mxu0 %v1354_v17 }
  0x6a   :  { %1022 = vmatpush1.bf16.msra.mxu1 %v1355_v18  ;;  %1263 = vmatprep.subr.bf16.mxu0 %v1356_v20 }
  0x6b   :  { %1023 = vmatprep.subr.bf16.mxu1 %v1458_v19  ;;  %1013 = vmatprep.mubr.bf16.mxu0 %v63_v39 }
  0x6c   :  { %1172 = vmatprep.mubr.msk.bf16.mxu1 %vm817_vm0, %v65_v45 }
  0x6d   :  { %1264 = vmatpush3.bf16.msra.mxu0 %v1357_v21 }
  0x6e   :  { %1024 = vmatpush1.bf16.msra.mxu1 %v1358_v22  ;;  %1265 = vmatprep.subr.bf16.mxu0 %v1359_v23 }
  0x6f   :  { %1025 = vmatprep.subr.bf16.mxu1 %v1458_v19 }
  0x71   :  { %1266 = vmatpush3.bf16.msra.mxu0 %v1360_v24 }
  0x72   :  { %1026 = vmatpush1.bf16.msra.mxu1 %v1361_v25  ;;  %1267 = vmatprep.subr.bf16.mxu0 %v1362_v26 }
  0x73   :  { %1027 = vmatprep.subr.bf16.mxu1 %v1458_v19 }
  0x75   :  { %1268 = vmatpush3.bf16.msra.mxu0 %v1363_v27 }
  0x76   :  { %1028 = vmatpush1.bf16.msra.mxu1 %v1364_v28  ;;  %1269 = vmatprep.subr.bf16.mxu0 %v1365_v29 }
  0x77   :  { %1029 = vmatprep.subr.bf16.mxu1 %v1458_v19 }
  0x79   :  { %1270 = vmatpush3.bf16.msra.mxu0 %v1366_v30 }
  0x7a   :  { %1030 = vmatpush1.bf16.msra.mxu1 %v1367_v31  ;;  %1271 = vmatprep.subr.bf16.mxu0 %v1368_v32 }
  0x7b   :  { %1031 = vmatprep.subr.bf16.mxu1 %v1458_v19 }
  0x7d   :  { %1272 = vmatpush3.bf16.msra.mxu0 %v1369_v33 }
  0x7e   :  { %1032 = vmatpush1.bf16.msra.mxu1 %v1370_v34  ;;  %1273 = vmatprep.subr.bf16.mxu0 %v1371_v35 }
  0x7f   :  { %1033 = vmatprep.subr.bf16.mxu1 %v1458_v19 }
  0x81   :  { %1274 = vmatpush3.bf16.msra.mxu0 %v1372_v36 }
  0x82   :  { %1034 = vmatpush1.bf16.msra.mxu1 %v1373_v38  ;;  %1275 = vmatprep.subr.bf16.mxu0 %v1374_v40 }
  0x83   :  { %1035 = vmatprep.subr.bf16.mxu1 %v1458_v19 }
  0x85   :  { %1276 = vmatpush3.bf16.msra.mxu0 %v1375_v41 }
  0x86   :  { %1036 = vmatpush1.bf16.msra.mxu1 %v1376_v42 }
  0x87   :  { %1037 = vmatprep.subr.bf16.mxu1 %v1458_v19 }
  0x88   :  { %1014 = vmatmul.mubr.bf16.vlgmr.msra.gmra.mrb[8].mxu0 %v62_v46 }
  0x8a   :  { %1038 = vmatpush1.bf16.msra.mxu1 %v1377_v47 }
  0x8b   :  { %1039 = vmatprep.subr.bf16.mxu1 %v1458_v19 }
  0x8e   :  { %1040 = vmatpush1.bf16.msra.mxu1 %v1378_v48 }
  0x8f   :  { %1041 = vmatprep.subr.bf16.mxu1 %v1458_v19 }
  0x92   :  { %1042 = vmatpush1.bf16.msra.mxu1 %v1379_v49 }
  0x93   :  { %1043 = vmatprep.subr.bf16.mxu1 %v1458_v19 }
  0x96   :  { %1044 = vmatpush1.bf16.msra.mxu1 %v1380_v50 }
  0x97   :  { %1045 = vmatprep.subr.bf16.mxu1 %v1458_v19 }
  0x9a   :  { %1046 = vmatpush1.bf16.msra.mxu1 %v1381_v51 }
  0x9d   :  { %1054 = vmatmul.mubr.bf16.vlgmr.msra.gmra.mrb[8].mxu1 %v64_v53 }
 0x11b   :  { %v1189_v54 = vpop.f32.mrb[0].mxu0 }
 0x11c   :  { %v1211_v55 = vpop.f32.mrb[0].mxu1  ;;  %v1190_v57 = vpop.f32.mrb[1].mxu0 }
 0x11d   :  { %v1212_v58 = vpop.f32.mrb[1].mxu1  ;;  %v1191_v59 = vadd.f32 %v1190_v57, %v1189_v54  ;;  %v1192_v62 = vpop.f32.mrb[2].mxu0 }
 0x11e   :  { %v1213_v60 = vadd.f32 %v1212_v58, %v1211_v55  ;;  %v1214_v61 = vpop.f32.mrb[2].mxu1  ;;  %v1193_v0 = vpop.f32.mrb[3].mxu0 }
 0x11f   :  { %v1215_v63 = vpop.f32.mrb[3].mxu1  ;;  %v856_v1 = vadd.f32 %v1191_v59, %v1078_v56 }
 0x121   :  { %v896_v2 = vadd.f32 %v1213_v60, %v856_v1 }
 0x13b   :  { %v1233_v3 = vpop.f32.mrb[4].mxu0 }
 0x13c   :  { %v1255_v4 = vpop.f32.mrb[4].mxu1  ;;  %v1234_v5 = vpop.f32.mrb[5].mxu0 }
 0x13d   :  { %v1235_v6 = vadd.f32 %v1234_v5, %v1233_v3  ;;  %v1256_v7 = vpop.f32.mrb[5].mxu1  ;;  %v1236_v8 = vpop.f32.mrb[6].mxu0 }
 0x13e   :  { %v1257_v9 = vadd.f32 %v1256_v7, %v1255_v4  ;;  %v1258_v10 = vpop.f32.mrb[6].mxu1  ;;  %v1237_v11 = vpop.f32.mrb[7].mxu0 }
 0x13f   :  { %v936_v12 = vadd.f32 %v1235_v6, %v896_v2  ;;  %v1259_v13 = vpop.f32.mrb[7].mxu1 }
 0x141   :  { %v976_v14 = vadd.f32 %v1257_v9, %v936_v12 }
 0x15b   :  { %v1277_v15 = vpop.f32.mrb[8].mxu0 }
 0x15c   :  { %v1278_v16 = vpop.f32.mrb[9].mxu0 }
 0x15d   :  { %v1279_v17 = vadd.f32 %v1278_v16, %v1277_v15  ;;  %v1280_v18 = vpop.f32.mrb[10].mxu0 }
 0x15e   :  { %v1281_v19 = vpop.f32.mrb[11].mxu0 }
 0x15f   :  { %v1016_v20 = vadd.f32 %v1279_v17, %v976_v14 }
 0x170   :  { %v1055_v21 = vpop.f32.mrb[8].mxu1 }
 0x171   :  { %v1056_v22 = vadd.f32 %v1055_v21, %v1016_v20  ;;  %v1057_v23 = vpop.f32.mrb[9].mxu1 }
 0x172   :  { %v1058_v24 = vpop.f32.mrb[10].mxu1 }
 0x173   :  { %1061 = vst [vmem:[#allocation7] sm:$0xff] %v1056_v22  ;;  %v1059_v25 = vpop.f32.mrb[11].mxu1 }
 0x174   :  { %1437 = shalt.err (!%p1434_p6)
}
 0x175   :  { %s1438_s15 = scalar_lea.hbm %s1542_s3, 128 }
 0x176   :  { %p1439_p7 = scmp.ne.s32.totalorder %s1542_s3, %s1438_s15  ;;  %p1442_p8 = scmp.lt.u32.totalorder %s1438_s15, %s1542_s3 }
 0x178   :  { %p1444_p9 = pnand %p1442_p8, %p1439_p7 }
 0x17a   :  { %1447 = shalt.err (!%p1444_p9)
}
 0x17b   :  { %1071 = dma.vmem_to_hbm [thread:$0]  %s1069_s11, 128, %s1542_s3, [#allocation4]  }
 0x17c   :  { %1452 = dma.done.wait [#allocation4], 128  }
 0x17d   :  { %1453 = vsyncadd [#allocation4], 4294967168 }
 0x17e   :  { %1075 = vsyncpa [#allocation3], 1 }
 0x17f   :  { %1076 = vsyncpa [#allocation6], 1 }
 0x180   :  { %1077 = vsyncpa [#allocation4], 1 }

</bundles_post_ra>
